<compile_context>
chip_gen: v6e
topology: v6e:2x2x1
jax: 0.10.0
libtpu: 0.0.40
codegen_flags: <defaults>
</compile_context>

<pallas_src>
import functools

import numpy as np

import jax
import jax.numpy as jnp
from jax.experimental import pallas as pl
from jax.experimental.pallas import tpu as pltpu

LANE = 128      # TPU lane width  (last-dim vreg extent)
SUBLANE = 8     # TPU sublane width (second-to-last-dim vreg extent)


def _round_up(x, m):
    return (x + m - 1) // m * m


# ----------------------------------------------------------------------------
# Fused kernel: hidden MLP (Linear + folded-BN shift + ReLU) + stacked heads
# ----------------------------------------------------------------------------
def _mlp_multihead_kernel(x_ref, *refs, num_hidden, mxu_dtype, epilogue_dtype):
    """Processes one (row_tile, F) slab of rows end-to-end.

    refs layout (in order): [w_0, shift_0, ..., w_{H-1}, shift_{H-1},
                             w_heads, b_heads, o_ref]
    Every weight / shift operand has a constant index_map so it stays resident
    in VMEM across the whole grid; only the input / output row slabs move.
    """
    o_ref = refs[-1]

    h = x_ref[...]
    for i in range(num_hidden):                      # static unroll over layers
        w = refs[2 * i][...]
        shift = refs[2 * i + 1][...]
        lhs = h if h.dtype == mxu_dtype else h.astype(mxu_dtype)
        acc = jnp.dot(lhs, w, preferred_element_type=jnp.float32)
        if acc.dtype != epilogue_dtype:
            acc = acc.astype(epilogue_dtype)
        h = jnp.maximum(acc + shift, 0.0)            # folded-BN shift + ReLU

    wh = refs[2 * num_hidden][...]
    bh = refs[2 * num_hidden + 1][...]
    lhs = h if h.dtype == mxu_dtype else h.astype(mxu_dtype)
    y = jnp.dot(lhs, wh, preferred_element_type=jnp.float32) + bh
    o_ref[...] = y.astype(o_ref.dtype)


# ----------------------------------------------------------------------------
# Tiling / spec helpers
# ----------------------------------------------------------------------------
def _choose_row_tiling(m, cap=512):
    """Return (row_tile, padded_rows).

    * prefer one big step if the whole row extent fits under `cap`
    * otherwise use tiles <= cap with an EVEN number of grid steps, so the
      single 'parallel' grid axis load-balances across v7x's two TensorCores
    * rows are padded up to a tile multiple (wrapper zero-pads, then slices)
    """
    m8 = _round_up(max(m, SUBLANE), SUBLANE)
    if m8 <= cap:
        return m8, m8
    steps = pl.cdiv(m8, cap)
    if steps % 2:
        steps += 1
    tm = _round_up(pl.cdiv(m8, steps), SUBLANE)
    return tm, tm * steps


def _const_spec(shape, single_buffer):
    """BlockSpec for an operand whose block index never changes over the grid."""
    index_map = lambda i: (0,) * len(shape)
    if single_buffer:
        # resident weights only need ONE VMEM buffer (halves their footprint)
        return pl.BlockSpec(shape, index_map, pipeline_mode=pl.Buffered(1))
    return pl.BlockSpec(shape, index_map)


_SINGLE_BUFFER_WEIGHTS_OK = True   # flipped off once if Buffered(1) is rejected


# ----------------------------------------------------------------------------
# Forward wrapper
# ----------------------------------------------------------------------------
def moby_mlp_multihead_forward(x, kparams, *, row_tile_cap=512, out_dtype=None):
    """x: (B, S, in_dim) -> list of num_tasks arrays of shape (B, S, out_dim)."""
    global _SINGLE_BUFFER_WEIGHTS_OK

    B, S, F = x.shape
    M = B * S
    hidden = kparams["hidden"]                       # list of (w_folded, shift)
    wh, bh = kparams["heads"]                        # stacked + lane-padded heads
    num_tasks, out_dim = kparams["num_tasks"], kparams["out_dim"]
    h_cols = kparams["logical_head_cols"]            # num_tasks * out_dim
    htot_pad = wh.shape[1]                           # multiple of 128 (lane-dense)
    out_dtype = np.dtype(x.dtype) if out_dtype is None else np.dtype(out_dtype)

    tm, m_pad = _choose_row_tiling(M, cap=row_tile_cap)
    x2d = x.reshape(M, F)                            # collapse batch*seq into M
    if m_pad != M:
        x2d = jnp.pad(x2d, ((0, m_pad - M), (0, 0)))  # rows are independent

    flat_args = []
    for w, s in hidden:
        flat_args += [w, s]
    flat_args += [wh, bh]

    kern = functools.partial(
        _mlp_multihead_kernel,
        num_hidden=len(hidden),
        mxu_dtype=kparams["mxu_dtype"],
        epilogue_dtype=kparams["epilogue_dtype"],
    )

    # advisory cost estimate for XLA scheduling around the fused call
    flops = 0
    for w, _ in hidden:
        flops += 2 * m_pad * w.shape[0] * w.shape[1]
    flops += 2 * m_pad * wh.shape[0] * wh.shape[1]
    weight_bytes = sum(int(a.size) * a.dtype.itemsize for a in flat_args)
    bytes_accessed = (int(x2d.size) * x2d.dtype.itemsize + weight_bytes
                      + m_pad * htot_pad * out_dtype.itemsize)
    cost = pl.CostEstimate(flops=int(flops), transcendentals=0,
                           bytes_accessed=int(bytes_accessed))

    def run(single_buffer):
        in_specs = [pl.BlockSpec((tm, F), lambda i: (i, 0))]
        in_specs += [_const_spec(a.shape, single_buffer) for a in flat_args]
        weight_bufs = 1 if single_buffer else 2
        io_bytes = 2 * tm * (F * x2d.dtype.itemsize + htot_pad * out_dtype.itemsize)
        vmem_limit = int(1.5 * (weight_bufs * weight_bytes + io_bytes)) + (8 << 20)
        vmem_limit = max(32 << 20, min(vmem_limit, 128 << 20))
        return pl.pallas_call(
            kern,
            out_shape=jax.ShapeDtypeStruct((m_pad, htot_pad), out_dtype),
            grid=(m_pad // tm,),
            in_specs=in_specs,
            out_specs=pl.BlockSpec((tm, htot_pad), lambda i: (i, 0)),
            compiler_params=pltpu.CompilerParams(
                dimension_semantics=("parallel",),
                vmem_limit_bytes=vmem_limit),
            cost_estimate=cost,
        )(x2d, *flat_args)

    if _SINGLE_BUFFER_WEIGHTS_OK:
        try:
            y2d = run(single_buffer=True)
        except Exception:
            _SINGLE_BUFFER_WEIGHTS_OK = False        # fall back to default 2-deep
            y2d = run(single_buffer=False)
    else:
        y2d = run(single_buffer=False)

    # strip row padding + lane padding; per-task slicing stays in the wrapper
    y = y2d[:M, :h_cols].reshape(B, S, h_cols)
    return [y[:, :, t * out_dim:(t + 1) * out_dim] for t in range(num_tasks)]


# ----------------------------------------------------------------------------
# Parameter construction (raw, PyTorch-equivalent) + host-side fold / pad / cast
# ----------------------------------------------------------------------------
def make_params(key, in_dim, inner_dim, out_dim, num_layers, num_tasks):
    """Raw parameters; weights stored (in, out) = transposed PyTorch layout."""
    num_hidden = num_layers - 1
    if num_hidden >= 1:
        # The PyTorch module applies nn.Linear(in_dim, out_dim) heads to the
        # OUTPUT of linear_hidden, so it is only runnable when
        # inner_dim == in_dim (or num_layers == 1).  We mirror that constraint.
        assert inner_dim == in_dim, "module requires inner_dim == in_dim when num_layers >= 2"

    nk = 6 * num_hidden + 2 * num_tasks
    ks = iter(jax.random.split(key, max(nk, 2)))

    def nrm(shape, s=0.2):
        return s * jax.random.normal(next(ks), shape, jnp.float32)

    def uni(shape, lo=0.5, hi=1.5):
        return jax.random.uniform(next(ks), shape, jnp.float32, lo, hi)

    hidden = []
    d_in = in_dim
    for _ in range(num_hidden):
        w = nrm((d_in, inner_dim))
        b = nrm((inner_dim,))
        gamma = uni((inner_dim,))
        beta = nrm((inner_dim,), 0.1)
        mean = nrm((inner_dim,), 0.1)
        var = uni((inner_dim,))
        hidden.append((w, b, gamma, beta, mean, var))
        d_in = inner_dim

    heads = [(nrm((in_dim, out_dim)), nrm((out_dim,))) for _ in range(num_tasks)]
    return {"hidden": hidden, "heads": heads}


def prepare_params(params, *, eps=1e-5, use_bf16=False, bf16_epilogue=False):
    """Fold eval-mode BatchNorm into the Linears, stack all task heads into one
    matmul, zero-pad every lane (column) dim to a multiple of 128 and cast for
    the MXU.  bf16_epilogue keeps the +shift/ReLU in bf16 (v6e/v7x only)."""
    num_tasks = len(params["heads"])
    out_dim = params["heads"][0][0].shape[1]

    mxu_dtype = jnp.bfloat16 if use_bf16 else jnp.float32
    epilogue_dtype = jnp.bfloat16 if (use_bf16 and bf16_epilogue) else jnp.float32

    hidden = []
    prev_pad = None                                  # padded width of prev output
    for (w, b, gamma, beta, mean, var) in params["hidden"]:
        scale = gamma / jnp.sqrt(var + eps)          # eval-mode BN
        w_f = w * scale[None, :]                     # fold BN scale into Linear
        shift = scale * (b - mean) + beta            # folded shift
        k, n = w_f.shape
        k_pad = k if prev_pad is None else prev_pad
        n_pad = _round_up(n, LANE)
        w_f = jnp.pad(w_f, ((0, k_pad - k), (0, n_pad - n)))
        shift = jnp.pad(shift, (0, n_pad - n))[None, :]
        hidden.append((w_f.astype(mxu_dtype), shift.astype(epilogue_dtype)))
        prev_pad = n_pad

    # all task heads stacked column-wise into one lane-dense matmul
    wh = jnp.concatenate([w for (w, _) in params["heads"]], axis=1)
    bh = jnp.concatenate([b for (_, b) in params["heads"]], axis=0)
    k, n = wh.shape
    k_pad = k if prev_pad is None else prev_pad
    n_pad = _round_up(n, LANE)
    wh = jnp.pad(wh, ((0, k_pad - k), (0, n_pad - n))).astype(mxu_dtype)
    bh = jnp.pad(bh, (0, n_pad - n))[None, :].astype(jnp.float32)

    return {"hidden": hidden, "heads": (wh, bh),
            "num_tasks": num_tasks, "out_dim": out_dim,
            "logical_head_cols": num_tasks * out_dim,
            "mxu_dtype": mxu_dtype, "epilogue_dtype": epilogue_dtype}


# ----------------------------------------------------------------------------
# Pure-JAX reference (mirrors the PyTorch module in eval() mode)
# ----------------------------------------------------------------------------
def reference_forward(x, params, eps=1e-5):
    B, S, F = x.shape
    h = x.reshape(-1, F).astype(jnp.float32)
    for (w, b, gamma, beta, mean, var) in params["hidden"]:
        h = h @ w + b
        h = (h - mean) / jnp.sqrt(var + eps) * gamma + beta   # BatchNorm1d (eval)
        h = jnp.maximum(h, 0.0)
    return [(h @ wt + bt).reshape(B, S, -1) for (wt, bt) in params["heads"]]


# ----------------------------------------------------------------------------
if __name__ == "__main__":
    # small config consistent with the module (num_layers=2 requires inner == in)
    B, S = 2, 8
    in_dim = inner_dim = 32
    out_dim = 16
    num_layers = 2
    num_tasks = 3

    key = jax.random.PRNGKey(0)
    kx, kp = jax.random.split(key)
    x = jax.random.normal(kx, (B, S, in_dim), jnp.float32)
    params = make_params(kp, in_dim, inner_dim, out_dim, num_layers, num_tasks)
    refs = reference_forward(x, params)

    # f32 path (tight tolerance)
    kparams = prepare_params(params)
    outs = moby_mlp_multihead_forward(x, kparams)
    outs = [jax.block_until_ready(o) for o in outs]
    for o, r in zip(outs, refs):
        assert o.shape == (B, S, out_dim)
        assert jnp.allclose(o, r, atol=1e-4, rtol=1e-4), float(jnp.max(jnp.abs(o - r)))

    # bf16-MXU path (f32 accumulation + f32 epilogue), looser tolerance
    kparams_bf16 = prepare_params(params, use_bf16=True)
    outs_bf16 = moby_mlp_multihead_forward(x, kparams_bf16)
    outs_bf16 = [jax.block_until_ready(o) for o in outs_bf16]
    for o, r in zip(outs_bf16, refs):
        assert o.shape == (B, S, out_dim)
        assert jnp.allclose(o, r, atol=5e-2, rtol=5e-2), float(jnp.max(jnp.abs(o - r)))

    print("KERNEL_OK")
</pallas_src>

<mosaic_0001>
module attributes {stable_mosaic.version = 11 : i64} {
  func.func @_mlp_multihead_kernel(%arg0: i32, %arg1: memref<16x32xf32, #tpu.memory_space<vmem>>, %arg2: memref<32x128xf32, #tpu.memory_space<vmem>>, %arg3: memref<1x128xf32, #tpu.memory_space<vmem>>, %arg4: memref<128x128xf32, #tpu.memory_space<vmem>>, %arg5: memref<1x128xf32, #tpu.memory_space<vmem>>, %arg6: memref<16x128xf32, #tpu.memory_space<vmem>>) attributes {dimension_semantics = [#tpu.dimension_semantics<parallel>], iteration_bounds = array<i64: 1>, scalar_prefetch = 0 : i64, scratch_operands = 0 : i64, tpu.core_type = #tpu.core_type<tc>, window_params = [{transform_indices = @transform_0, window_bounds = array<i64: 16, 32>}, {pipeline_mode = #tpu.pipeline_mode<synchronous>, transform_indices = @transform_1, window_bounds = array<i64: 32, 128>}, {pipeline_mode = #tpu.pipeline_mode<synchronous>, transform_indices = @transform_2, window_bounds = array<i64: 1, 128>}, {pipeline_mode = #tpu.pipeline_mode<synchronous>, transform_indices = @transform_3, window_bounds = array<i64: 128, 128>}, {pipeline_mode = #tpu.pipeline_mode<synchronous>, transform_indices = @transform_4, window_bounds = array<i64: 1, 128>}, {transform_indices = @transform_5, window_bounds = array<i64: 16, 128>}]} {
    %c0 = arith.constant 0 : index
    %c0_0 = arith.constant 0 : index
    %0 = vector.load %arg1[%c0, %c0_0] : memref<16x32xf32, #tpu.memory_space<vmem>>, vector<16x32xf32>
    %c0_1 = arith.constant 0 : index
    %c0_2 = arith.constant 0 : index
    %1 = vector.load %arg2[%c0_1, %c0_2] : memref<32x128xf32, #tpu.memory_space<vmem>>, vector<32x128xf32>
    %c0_3 = arith.constant 0 : index
    %c0_4 = arith.constant 0 : index
    %2 = vector.load %arg3[%c0_3, %c0_4] : memref<1x128xf32, #tpu.memory_space<vmem>>, vector<1x128xf32>
    %cst = arith.constant dense<0.000000e+00> : vector<16x128xf32>
    %3 = tpu.matmul %0, %1, %cst {dimension_numbers = #tpu.dot_dimension_numbers<[1], [0], [0], [1], [0, 0, 1, 1], [], []>} : vector<16x32xf32>, vector<32x128xf32>, vector<16x128xf32> -> vector<16x128xf32>
    %4 = vector.broadcast %2 : vector<1x128xf32> to vector<16x128xf32>
    %5 = arith.addf %3, %4 : vector<16x128xf32>
    %cst_5 = arith.constant 0.000000e+00 : f32
    %6 = vector.broadcast %cst_5 : f32 to vector<16x128xf32>
    %7 = arith.maximumf %5, %6 : vector<16x128xf32>
    %c0_6 = arith.constant 0 : index
    %c0_7 = arith.constant 0 : index
    %8 = vector.load %arg4[%c0_6, %c0_7] : memref<128x128xf32, #tpu.memory_space<vmem>>, vector<128x128xf32>
    %c0_8 = arith.constant 0 : index
    %c0_9 = arith.constant 0 : index
    %9 = vector.load %arg5[%c0_8, %c0_9] : memref<1x128xf32, #tpu.memory_space<vmem>>, vector<1x128xf32>
    %cst_10 = arith.constant dense<0.000000e+00> : vector<16x128xf32>
    %10 = tpu.matmul %7, %8, %cst_10 {dimension_numbers = #tpu.dot_dimension_numbers<[1], [0], [0], [1], [0, 0, 1, 1], [], []>} : vector<16x128xf32>, vector<128x128xf32>, vector<16x128xf32> -> vector<16x128xf32>
    %11 = vector.broadcast %9 : vector<1x128xf32> to vector<16x128xf32>
    %12 = arith.addf %10, %11 : vector<16x128xf32>
    %c0_11 = arith.constant 0 : index
    %c0_12 = arith.constant 0 : index
    %13 = vector.load %arg6[%c0_11, %c0_12] : memref<16x128xf32, #tpu.memory_space<vmem>>, vector<16x128xf32>
    tpu.vector_store %arg6[%c0_11, %c0_12], %12 {strides = array<i32>} : memref<16x128xf32, #tpu.memory_space<vmem>>, vector<16x128xf32>,
    return
  }
  func.func @transform_0(%arg0: i32) -> (i32, i32) {
    %c0_i32 = arith.constant 0 : i32
    %c0_i32_0 = arith.constant 0 : i32
    return %arg0, %c0_i32 : i32, i32
  }
  func.func @transform_1(%arg0: i32) -> (i32, i32) {
    %c0_i32 = arith.constant 0 : i32
    %c0_i32_0 = arith.constant 0 : i32
    %c0_i32_1 = arith.constant 0 : i32
    return %c0_i32, %c0_i32_0 : i32, i32
  }
  func.func @transform_2(%arg0: i32) -> (i32, i32) {
    %c0_i32 = arith.constant 0 : i32
    %c0_i32_0 = arith.constant 0 : i32
    %c0_i32_1 = arith.constant 0 : i32
    return %c0_i32, %c0_i32_0 : i32, i32
  }
  func.func @transform_3(%arg0: i32) -> (i32, i32) {
    %c0_i32 = arith.constant 0 : i32
    %c0_i32_0 = arith.constant 0 : i32
    %c0_i32_1 = arith.constant 0 : i32
    return %c0_i32, %c0_i32_0 : i32, i32
  }
  func.func @transform_4(%arg0: i32) -> (i32, i32) {
    %c0_i32 = arith.constant 0 : i32
    %c0_i32_0 = arith.constant 0 : i32
    %c0_i32_1 = arith.constant 0 : i32
    return %c0_i32, %c0_i32_0 : i32, i32
  }
  func.func @transform_5(%arg0: i32) -> (i32, i32) {
    %c0_i32 = arith.constant 0 : i32
    %c0_i32_0 = arith.constant 0 : i32
    return %arg0, %c0_i32 : i32, i32
  }
}

module attributes {stable_mosaic.version = 11 : i64} {
  func.func @_mlp_multihead_kernel(%arg0: i32, %arg1: memref<16x32xf32, #tpu.memory_space<vmem>>, %arg2: memref<32x128xf32, #tpu.memory_space<vmem>>, %arg3: memref<1x128xf32, #tpu.memory_space<vmem>>, %arg4: memref<128x128xf32, #tpu.memory_space<vmem>>, %arg5: memref<1x128xf32, #tpu.memory_space<vmem>>, %arg6: memref<16x128xf32, #tpu.memory_space<vmem>>) attributes {dimension_semantics = [#tpu.dimension_semantics<parallel>], iteration_bounds = array<i64: 1>, scalar_prefetch = 0 : i64, scratch_operands = 0 : i64, tpu.core_type = #tpu.core_type<tc>, window_params = [{transform_indices = @transform_0, window_bounds = array<i64: 16, 32>}, {pipeline_mode = #tpu.pipeline_mode<synchronous>, transform_indices = @transform_1, window_bounds = array<i64: 32, 128>}, {pipeline_mode = #tpu.pipeline_mode<synchronous>, transform_indices = @transform_2, window_bounds = array<i64: 1, 128>}, {pipeline_mode = #tpu.pipeline_mode<synchronous>, transform_indices = @transform_3, window_bounds = array<i64: 128, 128>}, {pipeline_mode = #tpu.pipeline_mode<synchronous>, transform_indices = @transform_4, window_bounds = array<i64: 1, 128>}, {transform_indices = @transform_5, window_bounds = array<i64: 16, 128>}]} {
    %c0 = arith.constant 0 : index
    %c0_0 = arith.constant 0 : index
    %0 = vector.load %arg1[%c0, %c0_0] : memref<16x32xf32, #tpu.memory_space<vmem>>, vector<16x32xf32>
    %c0_1 = arith.constant 0 : index
    %c0_2 = arith.constant 0 : index
    %1 = vector.load %arg2[%c0_1, %c0_2] : memref<32x128xf32, #tpu.memory_space<vmem>>, vector<32x128xf32>
    %c0_3 = arith.constant 0 : index
    %c0_4 = arith.constant 0 : index
    %2 = vector.load %arg3[%c0_3, %c0_4] : memref<1x128xf32, #tpu.memory_space<vmem>>, vector<1x128xf32>
    %cst = arith.constant dense<0.000000e+00> : vector<16x128xf32>
    %3 = tpu.matmul %0, %1, %cst {dimension_numbers = #tpu.dot_dimension_numbers<[1], [0], [0], [1], [0, 0, 1, 1], [], []>} : vector<16x32xf32>, vector<32x128xf32>, vector<16x128xf32> -> vector<16x128xf32>
    %4 = vector.broadcast %2 : vector<1x128xf32> to vector<16x128xf32>
    %5 = arith.addf %3, %4 : vector<16x128xf32>
    %cst_5 = arith.constant 0.000000e+00 : f32
    %6 = vector.broadcast %cst_5 : f32 to vector<16x128xf32>
    %7 = arith.maximumf %5, %6 : vector<16x128xf32>
    %c0_6 = arith.constant 0 : index
    %c0_7 = arith.constant 0 : index
    %8 = vector.load %arg4[%c0_6, %c0_7] : memref<128x128xf32, #tpu.memory_space<vmem>>, vector<128x128xf32>
    %c0_8 = arith.constant 0 : index
    %c0_9 = arith.constant 0 : index
    %9 = vector.load %arg5[%c0_8, %c0_9] : memref<1x128xf32, #tpu.memory_space<vmem>>, vector<1x128xf32>
    %cst_10 = arith.constant dense<0.000000e+00> : vector<16x128xf32>
    %10 = tpu.matmul %7, %8, %cst_10 {dimension_numbers = #tpu.dot_dimension_numbers<[1], [0], [0], [1], [0, 0, 1, 1], [], []>} : vector<16x128xf32>, vector<128x128xf32>, vector<16x128xf32> -> vector<16x128xf32>
    %11 = vector.broadcast %9 : vector<1x128xf32> to vector<16x128xf32>
    %12 = arith.addf %10, %11 : vector<16x128xf32>
    %c0_11 = arith.constant 0 : index
    %c0_12 = arith.constant 0 : index
    %13 = vector.load %arg6[%c0_11, %c0_12] : memref<16x128xf32, #tpu.memory_space<vmem>>, vector<16x128xf32>
    tpu.vector_store %arg6[%c0_11, %c0_12], %12 {strides = array<i32>} : memref<16x128xf32, #tpu.memory_space<vmem>>, vector<16x128xf32>,
    return
  }
  func.func @transform_0(%arg0: i32) -> (i32, i32) {
    %c0_i32 = arith.constant 0 : i32
    %c0_i32_0 = arith.constant 0 : i32
    return %arg0, %c0_i32 : i32, i32
  }
  func.func @transform_1(%arg0: i32) -> (i32, i32) {
    %c0_i32 = arith.constant 0 : i32
    %c0_i32_0 = arith.constant 0 : i32
    %c0_i32_1 = arith.constant 0 : i32
    return %c0_i32, %c0_i32_0 : i32, i32
  }
  func.func @transform_2(%arg0: i32) -> (i32, i32) {
    %c0_i32 = arith.constant 0 : i32
    %c0_i32_0 = arith.constant 0 : i32
    %c0_i32_1 = arith.constant 0 : i32
    return %c0_i32, %c0_i32_0 : i32, i32
  }
  func.func @transform_3(%arg0: i32) -> (i32, i32) {
    %c0_i32 = arith.constant 0 : i32
    %c0_i32_0 = arith.constant 0 : i32
    %c0_i32_1 = arith.constant 0 : i32
    return %c0_i32, %c0_i32_0 : i32, i32
  }
  func.func @transform_4(%arg0: i32) -> (i32, i32) {
    %c0_i32 = arith.constant 0 : i32
    %c0_i32_0 = arith.constant 0 : i32
    %c0_i32_1 = arith.constant 0 : i32
    return %c0_i32, %c0_i32_0 : i32, i32
  }
  func.func @transform_5(%arg0: i32) -> (i32, i32) {
    %c0_i32 = arith.constant 0 : i32
    %c0_i32_0 = arith.constant 0 : i32
    return %arg0, %c0_i32 : i32, i32
  }
}

</mosaic_0001>

<bundles_post_ra>
// kernel: tpu_custom_call.1
= control target key start
LH: loop header
LB: loop body
LE: loop exit
PB: predicated region body
PF: predicated region fallthrough
CT: control target
= control target key end

     0   :  { %10 = vsyncpa [#allocation3], 0  ;;  %s511_s0 = inlined_call_operand.hbm [shape: f32[16,32], index: 0, kind: input, shape index: {}]   ;;  %s512_s1 = inlined_call_operand.hbm [shape: f32[32,128], index: 1, kind: input, shape index: {}]   ;;  %s513_s2 = inlined_call_operand.vmem [shape: f32[1,128], index: 2, kind: input, shape index: {}]   ;;  %s514_s3 = inlined_call_operand.hbm [shape: f32[128,128], index: 3, kind: input, shape index: {}]   ;;  %s515_s4 = inlined_call_operand.vmem [shape: f32[1,128], index: 4, kind: input, shape index: {}]   ;;  %s516_s5 = inlined_call_operand.hbm [shape: f32[16,128], index: 5, kind: output, shape index: {}]  }
   0x1   :  { %11 = vsyncpa [#allocation6], 0 }
   0x2   :  { %12 = vsyncpa [#allocation4], 0  ;;  %s443_s18 = smov [#allocation5]   ;;  %s444_s20 = smov [#allocation2]  }
   0x3   :  { %s30_s19 = sshll.u32 %s443_s18, 4  ;;  %s18_s21 = sshll.u32 %s444_s20, 4  ;;  %s31_s19 = int_to_ptr.vmem [resolvable:$true] %s30_s19  ;;  %s19_s21 = int_to_ptr.vmem [resolvable:$true] %s18_s21 }
   0x4   :  { %s365_s22 = scalar_lea.vmem %s31_s19, 512  ;;  %p370_p1 = scmp.lt.s32.totalorder %s31_s19, %s31_s19 }
   0x5   :  { %p366_p0 = scmp.ne.s32.totalorder %s31_s19, %s365_s22  ;;  %p371_p2 = scmp.lt.s32.totalorder %s365_s22, %s365_s22 }
   0x7   :  { %p372_p3 = por %p371_p2, %p370_p1 }
   0x9   :  { %p373_p4 = pnand %p372_p3, %p366_p0 }
   0xb   :  { %376 = shalt.err (!%p373_p4)
}
   0xc   :  { %s445_s23 = smov 128   ;;  %s446_s24 = smov 8  }
   0xd   :  { %36 = dma.hbm_to_vmem [thread:$0]  %s512_s1, 512, %s31_s19, [#allocation6], %s445_s23, %s445_s23, %s446_s24  }
   0xe   :  { %s385_s27 = scalar_lea.vmem %s19_s21, 256  ;;  %p390_p6 = scmp.lt.s32.totalorder %s19_s21, %s19_s21 }
   0xf   :  { %p386_p5 = scmp.ne.s32.totalorder %s19_s21, %s385_s27  ;;  %p391_p7 = scmp.lt.s32.totalorder %s385_s27, %s385_s27 }
  0x11   :  { %p392_p8 = por %p391_p7, %p390_p6 }
  0x13   :  { %p393_p9 = pnand %p392_p8, %p386_p5 }
  0x15   :  { %396 = shalt.err (!%p393_p9)
}
  0x16   :  { %24 = dma.hbm_to_vmem [thread:$0]  %s511_s0, 256, %s19_s21, [#allocation3], %s445_s23, %s445_s23, %s446_s24  }
  0x17   :  { %s447_s30 = smov [#allocation7]  }
  0x18   :  { %s44_s6 = sshll.u32 %s447_s30, 4  ;;  %s45_s6 = int_to_ptr.vmem [resolvable:$true] %s44_s6 }
  0x19   :  { %s405_s7 = scalar_lea.vmem %s45_s6, 2048  ;;  %p410_p11 = scmp.lt.s32.totalorder %s45_s6, %s45_s6 }
  0x1a   :  { %p406_p10 = scmp.ne.s32.totalorder %s45_s6, %s405_s7  ;;  %p411_p12 = scmp.lt.s32.totalorder %s405_s7, %s405_s7 }
  0x1c   :  { %p412_p13 = por %p411_p12, %p410_p11 }
  0x1e   :  { %p413_p0 = pnand %p412_p13, %p406_p10 }
  0x20   :  { %416 = shalt.err (!%p413_p0)
}
  0x21   :  { %50 = dma.hbm_to_vmem [thread:$0]  %s514_s3, 2048, %s45_s6, [#allocation6], %s445_s23, %s445_s23, %s446_s24  }
  0x22   :  { %437 = dma.done.wait [#allocation3], 256  }
  0x23   :  { %438 = vsyncadd [#allocation3], 4294967040 }
  0x24   :  { %439 = dma.done.wait [#allocation6], 2560  }
  0x25   :  { %440 = vsyncadd [#allocation6], 4294964736  ;;  %vm75_vm0 = vcmask 261120   ;;  %v67_v0 = vld [vmem:[#allocation5 + $0x18] sm:$0xff]  ;;  %v66_v1 = vld [vmem:[#allocation5 + $0x10] sm:$0xff]  ;;  %s448_s11 = smov [#allocation8]  }
  0x26   :  { %305 = vmatprep.subr.mxu0 %v67_v0  ;;  %v62_v2 = vld [vmem:[#allocation2] sm:$0xff]  ;;  %v65_v3 = vld [vmem:[#allocation5 + $0x8] sm:$0xff]  ;;  %v174_v4 = vld [vmem:[#allocation7 + $0x78] sm:$0xff]  ;;  %s264_s12 = sshll.u32 %s448_s11, 4  ;;  %s265_s12 = int_to_ptr.vmem [resolvable:$true] %s264_s12 }
  0x27   :  { %306 = vmatpush3.msra.mxu0 %v67_v0  ;;  %313 = vmatprep.mubr.msk.f32.mxu0 %vm75_vm0, %v62_v2  ;;  %v173_v5 = vld [vmem:[#allocation7 + $0x70] sm:$0xff]  ;;  %v64_v6 = vld [vmem:[#allocation5] sm:$0xff]  ;;  %v172_v7 = vld [vmem:[#allocation7 + $0x68] sm:$0xff]  ;;  %p422_p2 = scmp.lt.s32.totalorder %s265_s12, %s265_s12 }
  0x28   :  { %307 = vmatprep.subr.mxu0 %v66_v1  ;;  %316 = vmatprep.subr.mxu1 %v174_v4  ;;  %v63_v8 = vld [vmem:[#allocation2 + $0x8] sm:$0xff]  ;;  %v171_v9 = vld [vmem:[#allocation7 + $0x60] sm:$0xff]  ;;  %v169_v11 = vld [vmem:[#allocation7 + $0x50] sm:$0xff] }
  0x29   :  { %308 = vmatpush3.msra.mxu0 %v66_v1  ;;  %317 = vmatpush3.msra.mxu1 %v174_v4  ;;  %v170_v10 = vld [vmem:[#allocation7 + $0x58] sm:$0xff]  ;;  %v168_v12 = vld [vmem:[#allocation7 + $0x48] sm:$0xff]  ;;  %v167_v13 = vld [vmem:[#allocation7 + $0x40] sm:$0xff] }
  0x2a   :  { %309 = vmatprep.subr.mxu0 %v65_v3  ;;  %318 = vmatprep.subr.mxu1 %v173_v5  ;;  %v166_v14 = vld [vmem:[#allocation7 + $0x38] sm:$0xff]  ;;  %v165_v15 = vld [vmem:[#allocation7 + $0x30] sm:$0xff]  ;;  %v164_v16 = vld [vmem:[#allocation7 + $0x28] sm:$0xff] }
  0x2b   :  { %310 = vmatpush3.msra.mxu0 %v65_v3  ;;  %319 = vmatpush3.msra.mxu1 %v173_v5  ;;  %v163_v17 = vld [vmem:[#allocation7 + $0x20] sm:$0xff]  ;;  %v162_v18 = vld [vmem:[#allocation7 + $0x18] sm:$0xff]  ;;  %v161_v19 = vld [vmem:[#allocation7 + $0x10] sm:$0xff] }
  0x2c   :  { %311 = vmatprep.subr.mxu0 %v64_v6  ;;  %320 = vmatprep.subr.mxu1 %v172_v7  ;;  %v160_v20 = vld [vmem:[#allocation7 + $0x8] sm:$0xff]  ;;  %v159_v21 = vld [vmem:[#allocation7] sm:$0xff]  ;;  %v277_v22 = vld [vmem:[%s513_s2] ss:$0 sm:$0xff]  ;;  %s417_s2 = scalar_lea.vmem %s265_s12, 256 }
  0x2d   :  { %312 = vmatpush3.msra.mxu0 %v64_v6  ;;  %321 = vmatpush3.msra.mxu1 %v172_v7  ;;  %v280_v29 = vld [vmem:[%s515_s4] ss:$0 sm:$0xff]  ;;  %p418_p1 = scmp.ne.s32.totalorder %s265_s12, %s417_s2  ;;  %p423_p3 = scmp.lt.s32.totalorder %s417_s2, %s417_s2 }
  0x2e   :  { %314 = vmatmul.mubr.msk.f32.vlgmr.msra.gmra.mxu0 %vm75_vm0, %v63_v8  ;;  %322 = vmatprep.subr.mxu1 %v171_v9 }
  0x2f   :  { %323 = vmatpush3.msra.mxu1 %v171_v9  ;;  %p424_p4 = por %p423_p3, %p422_p2 }
  0x30   :  { %324 = vmatprep.subr.mxu1 %v170_v10 }
  0x31   :  { %325 = vmatpush3.msra.mxu1 %v170_v10  ;;  %p425_p5 = pnand %p424_p4, %p418_p1 }
  0x32   :  { %326 = vmatprep.subr.mxu1 %v169_v11 }
  0x33   :  { %327 = vmatpush3.msra.mxu1 %v169_v11 }
  0x34   :  { %328 = vmatprep.subr.mxu1 %v168_v12 }
  0x35   :  { %329 = vmatpush3.msra.mxu1 %v168_v12 }
  0x36   :  { %330 = vmatprep.subr.mxu1 %v167_v13 }
  0x37   :  { %331 = vmatpush3.msra.mxu1 %v167_v13 }
  0x38   :  { %332 = vmatprep.subr.mxu1 %v166_v14 }
  0x39   :  { %333 = vmatpush3.msra.mxu1 %v166_v14 }
  0x3a   :  { %334 = vmatprep.subr.mxu1 %v165_v15 }
  0x3b   :  { %335 = vmatpush3.msra.mxu1 %v165_v15 }
  0x3c   :  { %336 = vmatprep.subr.mxu1 %v164_v16 }
  0x3d   :  { %337 = vmatpush3.msra.mxu1 %v164_v16 }
  0x3e   :  { %338 = vmatprep.subr.mxu1 %v163_v17 }
  0x3f   :  { %339 = vmatpush3.msra.mxu1 %v163_v17 }
  0x40   :  { %340 = vmatprep.subr.mxu1 %v162_v18 }
  0x41   :  { %341 = vmatpush3.msra.mxu1 %v162_v18 }
  0x42   :  { %342 = vmatprep.subr.mxu1 %v161_v19 }
  0x43   :  { %343 = vmatpush3.msra.mxu1 %v161_v19 }
  0x44   :  { %344 = vmatprep.subr.mxu1 %v160_v20 }
  0x45   :  { %345 = vmatpush3.msra.mxu1 %v160_v20 }
  0x46   :  { %346 = vmatprep.subr.mxu1 %v159_v21 }
  0x47   :  { %347 = vmatpush3.msra.mxu1 %v159_v21 }
  0xee   :  { %v315_v23 = vpop.f32.mrf.mxu0 }
  0xef   :  { %v154_v24 = vadd.f32 %v315_v23, %v277_v22 }
  0xf0   :  { %v148_v25 = vpop.f32.mrf.mxu0 }
  0xf1   :  { %v149_v26 = vadd.f32 %v277_v22, %v148_v25  ;;  %v158_v28 = vmax.f32 %v154_v24, 0.0 }
  0xf3   :  { %v157_v27 = vmax.f32 %v149_v26, 0.0 }
  0xf5   :  { %348 = vmatprep.mubr.f32.mxu1 %v157_v27 }
  0xf6   :  { %349 = vmatmul.mubr.f32.vlgmr.msra.gmra.mxu1 %v158_v28 }
 0x1b6   :  { %v350_v30 = vpop.f32.mrf.mxu1 }
 0x1b7   :  { %v254_v31 = vadd.f32 %v350_v30, %v280_v29 }
 0x1b8   :  { %v248_v32 = vpop.f32.mrf.mxu1 }
 0x1b9   :  { %258 = vst [vmem:[#allocation8 + $0x8] sm:$0xff] %v254_v31  ;;  %v249_v33 = vadd.f32 %v280_v29, %v248_v32 }
 0x1bb   :  { %257 = vst [vmem:[#allocation8] sm:$0xff] %v249_v33 }
 0x1bc   :  { %428 = shalt.err (!%p425_p5)
}
 0x1bd   :  { %270 = dma.vmem_to_hbm [thread:$0]  %s265_s12, 256, %s516_s5, [#allocation4], %s445_s23, %s445_s23, %s446_s24  }
 0x1be   :  { %441 = dma.done.wait [#allocation4], 256  }
 0x1bf   :  { %442 = vsyncadd [#allocation4], 4294967040 }
 0x1c0   :  { %274 = vsyncpa [#allocation3], 1 }
 0x1c1   :  { %275 = vsyncpa [#allocation6], 1 }
 0x1c2   :  { %276 = vsyncpa [#allocation4], 1 }

// kernel: tpu_custom_call.1
= control target key start
LH: loop header
LB: loop body
LE: loop exit
PB: predicated region body
PF: predicated region fallthrough
CT: control target
= control target key end

     0   :  { %10 = vsyncpa [#allocation3], 0  ;;  %s511_s0 = inlined_call_operand.hbm [shape: f32[16,32], index: 0, kind: input, shape index: {}]   ;;  %s512_s1 = inlined_call_operand.hbm [shape: f32[32,128], index: 1, kind: input, shape index: {}]   ;;  %s513_s2 = inlined_call_operand.vmem [shape: f32[1,128], index: 2, kind: input, shape index: {}]   ;;  %s514_s3 = inlined_call_operand.hbm [shape: f32[128,128], index: 3, kind: input, shape index: {}]   ;;  %s515_s4 = inlined_call_operand.vmem [shape: f32[1,128], index: 4, kind: input, shape index: {}]   ;;  %s516_s5 = inlined_call_operand.hbm [shape: f32[16,128], index: 5, kind: output, shape index: {}]  }
   0x1   :  { %11 = vsyncpa [#allocation6], 0 }
   0x2   :  { %12 = vsyncpa [#allocation4], 0  ;;  %s443_s18 = smov [#allocation5]   ;;  %s444_s20 = smov [#allocation2]  }
   0x3   :  { %s30_s19 = sshll.u32 %s443_s18, 4  ;;  %s18_s21 = sshll.u32 %s444_s20, 4  ;;  %s31_s19 = int_to_ptr.vmem [resolvable:$true] %s30_s19  ;;  %s19_s21 = int_to_ptr.vmem [resolvable:$true] %s18_s21 }
   0x4   :  { %s365_s22 = scalar_lea.vmem %s31_s19, 512  ;;  %p370_p1 = scmp.lt.s32.totalorder %s31_s19, %s31_s19 }
   0x5   :  { %p366_p0 = scmp.ne.s32.totalorder %s31_s19, %s365_s22  ;;  %p371_p2 = scmp.lt.s32.totalorder %s365_s22, %s365_s22 }
   0x7   :  { %p372_p3 = por %p371_p2, %p370_p1 }
   0x9   :  { %p373_p4 = pnand %p372_p3, %p366_p0 }
   0xb   :  { %376 = shalt.err (!%p373_p4)
}
   0xc   :  { %s445_s23 = smov 128   ;;  %s446_s24 = smov 8  }
   0xd   :  { %36 = dma.hbm_to_vmem [thread:$0]  %s512_s1, 512, %s31_s19, [#allocation6], %s445_s23, %s445_s23, %s446_s24  }
   0xe   :  { %s385_s27 = scalar_lea.vmem %s19_s21, 256  ;;  %p390_p6 = scmp.lt.s32.totalorder %s19_s21, %s19_s21 }
   0xf   :  { %p386_p5 = scmp.ne.s32.totalorder %s19_s21, %s385_s27  ;;  %p391_p7 = scmp.lt.s32.totalorder %s385_s27, %s385_s27 }
  0x11   :  { %p392_p8 = por %p391_p7, %p390_p6 }
  0x13   :  { %p393_p9 = pnand %p392_p8, %p386_p5 }
  0x15   :  { %396 = shalt.err (!%p393_p9)
}
  0x16   :  { %24 = dma.hbm_to_vmem [thread:$0]  %s511_s0, 256, %s19_s21, [#allocation3], %s445_s23, %s445_s23, %s446_s24  }
  0x17   :  { %s447_s30 = smov [#allocation7]  }
  0x18   :  { %s44_s6 = sshll.u32 %s447_s30, 4  ;;  %s45_s6 = int_to_ptr.vmem [resolvable:$true] %s44_s6 }
  0x19   :  { %s405_s7 = scalar_lea.vmem %s45_s6, 2048  ;;  %p410_p11 = scmp.lt.s32.totalorder %s45_s6, %s45_s6 }
  0x1a   :  { %p406_p10 = scmp.ne.s32.totalorder %s45_s6, %s405_s7  ;;  %p411_p12 = scmp.lt.s32.totalorder %s405_s7, %s405_s7 }
  0x1c   :  { %p412_p13 = por %p411_p12, %p410_p11 }
  0x1e   :  { %p413_p0 = pnand %p412_p13, %p406_p10 }
  0x20   :  { %416 = shalt.err (!%p413_p0)
}
  0x21   :  { %50 = dma.hbm_to_vmem [thread:$0]  %s514_s3, 2048, %s45_s6, [#allocation6], %s445_s23, %s445_s23, %s446_s24  }
  0x22   :  { %437 = dma.done.wait [#allocation3], 256  }
  0x23   :  { %438 = vsyncadd [#allocation3], 4294967040 }
  0x24   :  { %439 = dma.done.wait [#allocation6], 2560  }
  0x25   :  { %440 = vsyncadd [#allocation6], 4294964736  ;;  %vm75_vm0 = vcmask 261120   ;;  %v67_v0 = vld [vmem:[#allocation5 + $0x18] sm:$0xff]  ;;  %v66_v1 = vld [vmem:[#allocation5 + $0x10] sm:$0xff]  ;;  %s448_s11 = smov [#allocation8]  }
  0x26   :  { %305 = vmatprep.subr.mxu0 %v67_v0  ;;  %v62_v2 = vld [vmem:[#allocation2] sm:$0xff]  ;;  %v65_v3 = vld [vmem:[#allocation5 + $0x8] sm:$0xff]  ;;  %v174_v4 = vld [vmem:[#allocation7 + $0x78] sm:$0xff]  ;;  %s264_s12 = sshll.u32 %s448_s11, 4  ;;  %s265_s12 = int_to_ptr.vmem [resolvable:$true] %s264_s12 }
  0x27   :  { %306 = vmatpush3.msra.mxu0 %v67_v0  ;;  %313 = vmatprep.mubr.msk.f32.mxu0 %vm75_vm0, %v62_v2  ;;  %v173_v5 = vld [vmem:[#allocation7 + $0x70] sm:$0xff]  ;;  %v64_v6 = vld [vmem:[#allocation5] sm:$0xff]  ;;  %v172_v7 = vld [vmem:[#allocation7 + $0x68] sm:$0xff]  ;;  %p422_p2 = scmp.lt.s32.totalorder %s265_s12, %s265_s12 }
  0x28   :  { %307 = vmatprep.subr.mxu0 %v66_v1  ;;  %316 = vmatprep.subr.mxu1 %v174_v4  ;;  %v63_v8 = vld [vmem:[#allocation2 + $0x8] sm:$0xff]  ;;  %v171_v9 = vld [vmem:[#allocation7 + $0x60] sm:$0xff]  ;;  %v169_v11 = vld [vmem:[#allocation7 + $0x50] sm:$0xff] }
  0x29   :  { %308 = vmatpush3.msra.mxu0 %v66_v1  ;;  %317 = vmatpush3.msra.mxu1 %v174_v4  ;;  %v170_v10 = vld [vmem:[#allocation7 + $0x58] sm:$0xff]  ;;  %v168_v12 = vld [vmem:[#allocation7 + $0x48] sm:$0xff]  ;;  %v167_v13 = vld [vmem:[#allocation7 + $0x40] sm:$0xff] }
  0x2a   :  { %309 = vmatprep.subr.mxu0 %v65_v3  ;;  %318 = vmatprep.subr.mxu1 %v173_v5  ;;  %v166_v14 = vld [vmem:[#allocation7 + $0x38] sm:$0xff]  ;;  %v165_v15 = vld [vmem:[#allocation7 + $0x30] sm:$0xff]  ;;  %v164_v16 = vld [vmem:[#allocation7 + $0x28] sm:$0xff] }
  0x2b   :  { %310 = vmatpush3.msra.mxu0 %v65_v3  ;;  %319 = vmatpush3.msra.mxu1 %v173_v5  ;;  %v163_v17 = vld [vmem:[#allocation7 + $0x20] sm:$0xff]  ;;  %v162_v18 = vld [vmem:[#allocation7 + $0x18] sm:$0xff]  ;;  %v161_v19 = vld [vmem:[#allocation7 + $0x10] sm:$0xff] }
  0x2c   :  { %311 = vmatprep.subr.mxu0 %v64_v6  ;;  %320 = vmatprep.subr.mxu1 %v172_v7  ;;  %v160_v20 = vld [vmem:[#allocation7 + $0x8] sm:$0xff]  ;;  %v159_v21 = vld [vmem:[#allocation7] sm:$0xff]  ;;  %v277_v22 = vld [vmem:[%s513_s2] ss:$0 sm:$0xff]  ;;  %s417_s2 = scalar_lea.vmem %s265_s12, 256 }
  0x2d   :  { %312 = vmatpush3.msra.mxu0 %v64_v6  ;;  %321 = vmatpush3.msra.mxu1 %v172_v7  ;;  %v280_v29 = vld [vmem:[%s515_s4] ss:$0 sm:$0xff]  ;;  %p418_p1 = scmp.ne.s32.totalorder %s265_s12, %s417_s2  ;;  %p423_p3 = scmp.lt.s32.totalorder %s417_s2, %s417_s2 }
  0x2e   :  { %314 = vmatmul.mubr.msk.f32.vlgmr.msra.gmra.mxu0 %vm75_vm0, %v63_v8  ;;  %322 = vmatprep.subr.mxu1 %v171_v9 }
  0x2f   :  { %323 = vmatpush3.msra.mxu1 %v171_v9  ;;  %p424_p4 = por %p423_p3, %p422_p2 }
  0x30   :  { %324 = vmatprep.subr.mxu1 %v170_v10 }
  0x31   :  { %325 = vmatpush3.msra.mxu1 %v170_v10  ;;  %p425_p5 = pnand %p424_p4, %p418_p1 }
  0x32   :  { %326 = vmatprep.subr.mxu1 %v169_v11 }
  0x33   :  { %327 = vmatpush3.msra.mxu1 %v169_v11 }
  0x34   :  { %328 = vmatprep.subr.mxu1 %v168_v12 }
  0x35   :  { %329 = vmatpush3.msra.mxu1 %v168_v12 }
  0x36   :  { %330 = vmatprep.subr.mxu1 %v167_v13 }
  0x37   :  { %331 = vmatpush3.msra.mxu1 %v167_v13 }
  0x38   :  { %332 = vmatprep.subr.mxu1 %v166_v14 }
  0x39   :  { %333 = vmatpush3.msra.mxu1 %v166_v14 }
  0x3a   :  { %334 = vmatprep.subr.mxu1 %v165_v15 }
  0x3b   :  { %335 = vmatpush3.msra.mxu1 %v165_v15 }
  0x3c   :  { %336 = vmatprep.subr.mxu1 %v164_v16 }
  0x3d   :  { %337 = vmatpush3.msra.mxu1 %v164_v16 }
  0x3e   :  { %338 = vmatprep.subr.mxu1 %v163_v17 }
  0x3f   :  { %339 = vmatpush3.msra.mxu1 %v163_v17 }
  0x40   :  { %340 = vmatprep.subr.mxu1 %v162_v18 }
  0x41   :  { %341 = vmatpush3.msra.mxu1 %v162_v18 }
  0x42   :  { %342 = vmatprep.subr.mxu1 %v161_v19 }
  0x43   :  { %343 = vmatpush3.msra.mxu1 %v161_v19 }
  0x44   :  { %344 = vmatprep.subr.mxu1 %v160_v20 }
  0x45   :  { %345 = vmatpush3.msra.mxu1 %v160_v20 }
  0x46   :  { %346 = vmatprep.subr.mxu1 %v159_v21 }
  0x47   :  { %347 = vmatpush3.msra.mxu1 %v159_v21 }
  0xee   :  { %v315_v23 = vpop.f32.mrf.mxu0 }
  0xef   :  { %v154_v24 = vadd.f32 %v315_v23, %v277_v22 }
  0xf0   :  { %v148_v25 = vpop.f32.mrf.mxu0 }
  0xf1   :  { %v149_v26 = vadd.f32 %v277_v22, %v148_v25  ;;  %v158_v28 = vmax.f32 %v154_v24, 0.0 }
  0xf3   :  { %v157_v27 = vmax.f32 %v149_v26, 0.0 }
  0xf5   :  { %348 = vmatprep.mubr.f32.mxu1 %v157_v27 }
  0xf6   :  { %349 = vmatmul.mubr.f32.vlgmr.msra.gmra.mxu1 %v158_v28 }
 0x1b6   :  { %v350_v30 = vpop.f32.mrf.mxu1 }
 0x1b7   :  { %v254_v31 = vadd.f32 %v350_v30, %v280_v29 }
 0x1b8   :  { %v248_v32 = vpop.f32.mrf.mxu1 }
 0x1b9   :  { %258 = vst [vmem:[#allocation8 + $0x8] sm:$0xff] %v254_v31  ;;  %v249_v33 = vadd.f32 %v280_v29, %v248_v32 }
 0x1bb   :  { %257 = vst [vmem:[#allocation8] sm:$0xff] %v249_v33 }
 0x1bc   :  { %428 = shalt.err (!%p425_p5)
}
 0x1bd   :  { %270 = dma.vmem_to_hbm [thread:$0]  %s265_s12, 256, %s516_s5, [#allocation4], %s445_s23, %s445_s23, %s446_s24  }
 0x1be   :  { %441 = dma.done.wait [#allocation4], 256  }
 0x1bf   :  { %442 = vsyncadd [#allocation4], 4294967040 }
 0x1c0   :  { %274 = vsyncpa [#allocation3], 1 }
 0x1c1   :  { %275 = vsyncpa [#allocation6], 1 }
 0x1c2   :  { %276 = vsyncpa [#allocation4], 1 }

</bundles_post_ra>
